<compile_context>
chip_gen: v5e
topology: v5e:2x2
jax: 0.10.0
libtpu: 0.0.40
codegen_flags: <defaults>
</compile_context>

<pallas_src>
import jax
import jax.numpy as jnp
from jax.experimental import pallas as pl
from jax.experimental.pallas import tpu as pltpu


def _round_up(a: int, b: int) -> int:
    return (a + b - 1) // b * b


def ffn_kernel(x_ref, w1_ref, b1_ref, w2_ref, b2_ref, o_ref, acc_ref):
    # grid = (token tiles i [parallel], hidden tiles h [arbitrary, reduction])
    # x_ref:  (tm, Ep)   token tile (same for every h step)
    # w1_ref: (Ep, th)   hidden-tile slice of W1
    # b1_ref: (1,  th)   hidden-tile slice of b1 (f32)
    # w2_ref: (th, Ep)   hidden-tile slice of W2
    # b2_ref: (1,  Ep)   output bias (f32, constant over the grid)
    # o_ref:  (tm, Ep)   output tile (resident across the h axis)
    # acc_ref:(tm, Ep)   f32 accumulator scratch
    h_idx = pl.program_id(1)

    @pl.when(h_idx == 0)
    def _init():
        acc_ref[...] = jnp.zeros_like(acc_ref)

    # (tm, Ep) @ (Ep, th) -> f32 (tm, th), add bias slice, ReLU.
    h = jnp.dot(x_ref[...], w1_ref[...], preferred_element_type=jnp.float32)
    h = jnp.maximum(h + b1_ref[...], 0.0)

    # Partial second matmul: (tm, th) @ (th, Ep) accumulated in f32.
    acc_ref[...] += jnp.dot(h.astype(w2_ref.dtype), w2_ref[...],
                            preferred_element_type=jnp.float32)

    @pl.when(h_idx == pl.num_programs(1) - 1)
    def _finalize():
        o_ref[...] = (acc_ref[...] + b2_ref[...]).astype(o_ref.dtype)


def classical_feedforward(x, w1, b1, w2, b2, *, tm=256, th=512, compute_dtype=None):
    """Fused FFN:  relu(x @ w1 + b1) @ w2 + b2.

    x:  (B, S, E)
    w1: (E, H)   b1: (H,)     with H = 4*E (any H works)
    w2: (H, E)   b2: (E,)
    compute_dtype: optional MXU operand dtype (e.g. jnp.bfloat16 on v6e/v7x);
                   biases and accumulation stay float32.
    """
    B, S, E = x.shape
    H = w1.shape[1]
    assert w1.shape == (E, H) and w2.shape == (H, E)
    M = B * S
    cdt = compute_dtype if compute_dtype is not None else x.dtype

    # Lane-dense padding: last dims to multiples of 128.
    Ep = _round_up(E, 128)
    # Row tile: large (MXU-filling) but don't over-pad tiny inputs; keep 8-aligned.
    tm = max(8, min(tm, _round_up(M, 8)))
    Mp = _round_up(M, tm)
    # Hidden tile: 128-aligned, and pad H so th divides it (extra hidden units are
    # all-zero weights/bias -> ReLU(0) = 0 -> contribute nothing).
    th = _round_up(min(th, _round_up(H, 128)), 128)
    Hp = _round_up(H, th)

    x2d = jnp.pad(x.reshape(M, E), ((0, Mp - M), (0, Ep - E))).astype(cdt)
    w1p = jnp.pad(w1, ((0, Ep - E), (0, Hp - H))).astype(cdt)
    b1p = jnp.pad(b1, (0, Hp - H)).reshape(1, Hp).astype(jnp.float32)
    w2p = jnp.pad(w2, ((0, Hp - H), (0, Ep - E))).astype(cdt)
    b2p = jnp.pad(b2, (0, Ep - E)).reshape(1, Ep).astype(jnp.float32)

    grid = (Mp // tm, Hp // th)

    itemsize = jnp.dtype(cdt).itemsize
    flops = 2 * Mp * Ep * Hp * 2  # two matmuls
    bytes_accessed = int(
        Mp * Ep * itemsize                       # x
        + grid[0] * (Ep * Hp + Hp * Ep) * itemsize  # weights streamed per token tile
        + (Hp + Ep) * 4                          # biases
        + Mp * Ep * jnp.dtype(x.dtype).itemsize  # output
    )

    out2d = pl.pallas_call(
        ffn_kernel,
        out_shape=jax.ShapeDtypeStruct((Mp, Ep), x.dtype),
        grid_spec=pltpu.PrefetchScalarGridSpec(
            num_scalar_prefetch=0,
            grid=grid,
            in_specs=[
                pl.BlockSpec((tm, Ep), lambda i, h: (i, 0)),  # x tile
                pl.BlockSpec((Ep, th), lambda i, h: (0, h)),  # W1 hidden slice
                pl.BlockSpec((1, th), lambda i, h: (0, h)),   # b1 hidden slice
                pl.BlockSpec((th, Ep), lambda i, h: (h, 0)),  # W2 hidden slice
                pl.BlockSpec((1, Ep), lambda i, h: (0, 0)),   # b2 (constant)
            ],
            out_specs=pl.BlockSpec((tm, Ep), lambda i, h: (i, 0)),
            scratch_shapes=[pltpu.VMEM((tm, Ep), jnp.float32)],
        ),
        compiler_params=pltpu.CompilerParams(
            dimension_semantics=("parallel", "arbitrary"),
            vmem_limit_bytes=48 * 1024 * 1024,
        ),
        cost_estimate=pl.CostEstimate(
            flops=flops, transcendentals=0, bytes_accessed=bytes_accessed),
    )(x2d, w1p, b1p, w2p, b2p)

    return out2d[:M, :E].reshape(B, S, E)


def reference_ffn(x, w1, b1, w2, b2):
    h = jnp.maximum(x @ w1 + b1, 0.0)
    return h @ w2 + b2


if __name__ == "__main__":
    key = jax.random.PRNGKey(0)

    def make_case(key, B, S, E):
        H = 4 * E
        k_x, k_w1, k_b1, k_w2, k_b2 = jax.random.split(key, 5)
        x = jax.random.normal(k_x, (B, S, E), dtype=jnp.float32)
        lim1 = 1.0 / (E ** 0.5)
        lim2 = 1.0 / (H ** 0.5)
        # PyTorch stores Linear weight as (out, in); transpose to (in, out).
        w1 = jax.random.uniform(k_w1, (H, E), minval=-lim1, maxval=lim1, dtype=jnp.float32).T
        b1 = jax.random.uniform(k_b1, (H,), minval=-lim1, maxval=lim1, dtype=jnp.float32)
        w2 = jax.random.uniform(k_w2, (E, H), minval=-lim2, maxval=lim2, dtype=jnp.float32).T
        b2 = jax.random.uniform(k_b2, (E,), minval=-lim2, maxval=lim2, dtype=jnp.float32)
        return x, w1, b1, w2, b2

    k1, k2 = jax.random.split(key)

    # Case 1: lane-dense shapes, multi-step grid on both axes (exercises the
    # accumulator init/finalize and the parallel token axis).
    x, w1, b1, w2, b2 = make_case(k1, B=2, S=128, E=128)   # M=256, H=512
    out = classical_feedforward(x, w1, b1, w2, b2, tm=128, th=256)  # grid (2, 2)
    out = jax.block_until_ready(out)
    ref = reference_ffn(x, w1, b1, w2, b2)
    assert out.shape == x.shape
    assert jnp.allclose(out, ref, atol=1e-4, rtol=1e-4), "case 1 mismatch vs reference"

    # Case 2: ragged shapes (M, E, H all non-multiples of tile sizes) -> padding path.
    x, w1, b1, w2, b2 = make_case(k2, B=2, S=10, E=96)     # M=20, H=384
    out = classical_feedforward(x, w1, b1, w2, b2)
    out = jax.block_until_ready(out)
    ref = reference_ffn(x, w1, b1, w2, b2)
    assert out.shape == x.shape
    assert jnp.allclose(out, ref, atol=1e-4, rtol=1e-4), "case 2 mismatch vs reference"

    print("KERNEL_OK")
</pallas_src>

<mosaic_0001>
module attributes {stable_mosaic.version = 11 : i64} {
  func.func @ffn_kernel(%arg0: i32, %arg1: i32, %arg2: memref<128x128xf32, #tpu.memory_space<vmem>>, %arg3: memref<128x256xf32, #tpu.memory_space<vmem>>, %arg4: memref<1x256xf32, #tpu.memory_space<vmem>>, %arg5: memref<256x128xf32, #tpu.memory_space<vmem>>, %arg6: memref<1x128xf32, #tpu.memory_space<vmem>>, %arg7: memref<128x128xf32, #tpu.memory_space<vmem>>, %arg8: memref<128x128xf32, #tpu.memory_space<vmem>>) attributes {dimension_semantics = [#tpu.dimension_semantics<parallel>, #tpu.dimension_semantics<arbitrary>], iteration_bounds = array<i64: 2, 2>, scalar_prefetch = 0 : i64, scratch_operands = 1 : i64, tpu.core_type = #tpu.core_type<tc>, window_params = [{transform_indices = @transform_0, window_bounds = array<i64: 128, 128>}, {transform_indices = @transform_1, window_bounds = array<i64: 128, 256>}, {transform_indices = @transform_2, window_bounds = array<i64: 1, 256>}, {transform_indices = @transform_3, window_bounds = array<i64: 256, 128>}, {pipeline_mode = #tpu.pipeline_mode<synchronous>, transform_indices = @transform_4, window_bounds = array<i64: 1, 128>}, {transform_indices = @transform_5, window_bounds = array<i64: 128, 128>}]} {
    %c0_i32 = arith.constant 0 : i32
    %0 = arith.cmpi eq, %arg1, %c0_i32 : i32
    %1 = arith.extui %0 : i1 to i32
    %c0_i32_0 = arith.constant 0 : i32
    %2 = arith.cmpi ne, %1, %c0_i32_0 : i32
    scf.if %2 {
      %cst_15 = arith.constant 0.000000e+00 : f32
      %19 = vector.broadcast %cst_15 : f32 to vector<128x128xf32>
      %c0_16 = arith.constant 0 : index
      %c0_17 = arith.constant 0 : index
      %20 = vector.load %arg8[%c0_16, %c0_17] : memref<128x128xf32, #tpu.memory_space<vmem>>, vector<128x128xf32>
      tpu.vector_store %arg8[%c0_16, %c0_17], %19 {strides = array<i32>} : memref<128x128xf32, #tpu.memory_space<vmem>>, vector<128x128xf32>,
    } else {
    }
    %c0 = arith.constant 0 : index
    %c0_1 = arith.constant 0 : index
    %3 = vector.load %arg2[%c0, %c0_1] : memref<128x128xf32, #tpu.memory_space<vmem>>, vector<128x128xf32>
    %c0_2 = arith.constant 0 : index
    %c0_3 = arith.constant 0 : index
    %4 = vector.load %arg3[%c0_2, %c0_3] : memref<128x256xf32, #tpu.memory_space<vmem>>, vector<128x256xf32>
    %cst = arith.constant dense<0.000000e+00> : vector<128x256xf32>
    %5 = tpu.matmul %3, %4, %cst {dimension_numbers = #tpu.dot_dimension_numbers<[1], [0], [0], [1], [0, 0, 1, 1], [], []>} : vector<128x128xf32>, vector<128x256xf32>, vector<128x256xf32> -> vector<128x256xf32>
    %c0_4 = arith.constant 0 : index
    %c0_5 = arith.constant 0 : index
    %6 = vector.load %arg4[%c0_4, %c0_5] : memref<1x256xf32, #tpu.memory_space<vmem>>, vector<1x256xf32>
    %7 = vector.broadcast %6 : vector<1x256xf32> to vector<128x256xf32>
    %8 = arith.addf %5, %7 : vector<128x256xf32>
    %cst_6 = arith.constant 0.000000e+00 : f32
    %9 = vector.broadcast %cst_6 : f32 to vector<128x256xf32>
    %10 = arith.maximumf %8, %9 : vector<128x256xf32>
    %c0_7 = arith.constant 0 : index
    %c0_8 = arith.constant 0 : index
    %11 = vector.load %arg8[%c0_7, %c0_8] : memref<128x128xf32, #tpu.memory_space<vmem>>, vector<128x128xf32>
    %c0_9 = arith.constant 0 : index
    %c0_10 = arith.constant 0 : index
    %12 = vector.load %arg5[%c0_9, %c0_10] : memref<256x128xf32, #tpu.memory_space<vmem>>, vector<256x128xf32>
    %cst_11 = arith.constant dense<0.000000e+00> : vector<128x128xf32>
    %13 = tpu.matmul %10, %12, %cst_11 {dimension_numbers = #tpu.dot_dimension_numbers<[1], [0], [0], [1], [0, 0, 1, 1], [], []>} : vector<128x256xf32>, vector<256x128xf32>, vector<128x128xf32> -> vector<128x128xf32>
    %14 = arith.addf %11, %13 : vector<128x128xf32>
    %c0_12 = arith.constant 0 : index
    %c0_13 = arith.constant 0 : index
    %15 = vector.load %arg8[%c0_12, %c0_13] : memref<128x128xf32, #tpu.memory_space<vmem>>, vector<128x128xf32>
    tpu.vector_store %arg8[%c0_12, %c0_13], %14 {strides = array<i32>} : memref<128x128xf32, #tpu.memory_space<vmem>>, vector<128x128xf32>,
    %c1_i32 = arith.constant 1 : i32
    %16 = arith.cmpi eq, %arg1, %c1_i32 : i32
    %17 = arith.extui %16 : i1 to i32
    %c0_i32_14 = arith.constant 0 : i32
    %18 = arith.cmpi ne, %17, %c0_i32_14 : i32
    scf.if %18 {
      %c0_15 = arith.constant 0 : index
      %c0_16 = arith.constant 0 : index
      %19 = vector.load %arg8[%c0_15, %c0_16] : memref<128x128xf32, #tpu.memory_space<vmem>>, vector<128x128xf32>
      %c0_17 = arith.constant 0 : index
      %c0_18 = arith.constant 0 : index
      %20 = vector.load %arg6[%c0_17, %c0_18] : memref<1x128xf32, #tpu.memory_space<vmem>>, vector<1x128xf32>
      %21 = vector.broadcast %20 : vector<1x128xf32> to vector<128x128xf32>
      %22 = arith.addf %19, %21 : vector<128x128xf32>
      %c0_19 = arith.constant 0 : index
      %c0_20 = arith.constant 0 : index
      %23 = vector.load %arg7[%c0_19, %c0_20] : memref<128x128xf32, #tpu.memory_space<vmem>>, vector<128x128xf32>
      tpu.vector_store %arg7[%c0_19, %c0_20], %22 {strides = array<i32>} : memref<128x128xf32, #tpu.memory_space<vmem>>, vector<128x128xf32>,
    } else {
    }
    return
  }
  func.func @transform_0(%arg0: i32, %arg1: i32) -> (i32, i32) {
    %c0_i32 = arith.constant 0 : i32
    %c0_i32_0 = arith.constant 0 : i32
    return %arg0, %c0_i32 : i32, i32
  }
  func.func @transform_1(%arg0: i32, %arg1: i32) -> (i32, i32) {
    %c0_i32 = arith.constant 0 : i32
    %c0_i32_0 = arith.constant 0 : i32
    return %c0_i32, %arg1 : i32, i32
  }
  func.func @transform_2(%arg0: i32, %arg1: i32) -> (i32, i32) {
    %c0_i32 = arith.constant 0 : i32
    %c0_i32_0 = arith.constant 0 : i32
    return %c0_i32, %arg1 : i32, i32
  }
  func.func @transform_3(%arg0: i32, %arg1: i32) -> (i32, i32) {
    %c0_i32 = arith.constant 0 : i32
    %c0_i32_0 = arith.constant 0 : i32
    return %arg1, %c0_i32 : i32, i32
  }
  func.func @transform_4(%arg0: i32, %arg1: i32) -> (i32, i32) {
    %c0_i32 = arith.constant 0 : i32
    %c0_i32_0 = arith.constant 0 : i32
    %c0_i32_1 = arith.constant 0 : i32
    return %c0_i32, %c0_i32_0 : i32, i32
  }
  func.func @transform_5(%arg0: i32, %arg1: i32) -> (i32, i32) {
    %c0_i32 = arith.constant 0 : i32
    %c0_i32_0 = arith.constant 0 : i32
    return %arg0, %c0_i32 : i32, i32
  }
}

</mosaic_0001>

<bundles_post_ra>
// kernel: tpu_custom_call.1
= control target key start
LH: loop header
LB: loop body
LE: loop exit
PB: predicated region body
PF: predicated region fallthrough
CT: control target
= control target key end

     0   :  { %s1905_s0 = inlined_call_operand.hbm [shape: f32[256,128], index: 0, kind: input, shape index: {}]   ;;  %s1906_s1 = inlined_call_operand.hbm [shape: f32[128,512], index: 1, kind: input, shape index: {}]   ;;  %s1907_s2 = inlined_call_operand.hbm [shape: f32[1,512], index: 2, kind: input, shape index: {}]   ;;  %s1908_s3 = inlined_call_operand.hbm [shape: f32[512,128], index: 3, kind: input, shape index: {}]   ;;  %s1909_s4 = inlined_call_operand.vmem [shape: f32[1,128], index: 4, kind: input, shape index: {}]   ;;  %s1910_s5 = inlined_call_operand.hbm [shape: f32[256,128], index: 5, kind: output, shape index: {}]  }
   0x1   :  { %1925 = sst [smem:[#allocation28_spill]] %s1905_s0 }
   0x2   :  { %1926 = sst [smem:[#allocation29_spill]] %s1906_s1 }
   0x3   :  { %1927 = sst [smem:[#allocation30_spill]] %s1909_s4 }
   0x4   :  { %1928 = sst [smem:[#allocation31_spill]] %s1910_s5 }
   0x5   :  { %10 = vsyncpa [#allocation4], 0 }
   0x6   :  { %12 = vsyncpa [#allocation4 + $0x1], 0 }
   0x7   :  { %13 = vsyncpa [#allocation7], 0 }
   0x8   :  { %15 = vsyncpa [#allocation7 + $0x1], 0 }
   0x9   :  { %16 = vsyncpa [#allocation10], 0 }
   0xa   :  { %18 = vsyncpa [#allocation10 + $0x1], 0 }
   0xb   :  { %19 = vsyncpa [#allocation5], 0 }
   0xc   :  { %21 = vsyncpa [#allocation5 + $0x1], 0  ;;  %s1498_s18 = smov 0   ;;  %s1500_s19 = smov 0  }
   0xd   :  { %s1502_s20 = smov 0   ;;  %s1504_s21 = smov 0  }
   0xe   :  { %s1506_s22 = smov 0   ;;  %s1508_s23 = smov 0  }
   0xf   :  { %s1510_s24 = smov 0   ;;  %s1512_s25 = smov 0  }
  0x10   :  { %s1514_s26 = smov 0   ;;  %s1516_s27 = smov 0  }
  0x11   :  { %s1518_s28 = smov 0  }
  0x12 LB: > { %1929 = sst [smem:[#allocation16_spill]] %s1426_s20  ;;  %p54_p0 = scmp.eq.s32.totalorder %s1458_s28, 0  ;;  %s1458_s28 = sphi %s1518_s28, %s27_s28   ;;  %s1454_s27 = sphi %s1516_s27, %s1965_s27   ;;  %s1450_s26 = sphi %s1514_s26, %s1971_s26   ;;  %s1446_s25 = sphi %s1512_s25, %s1963_s25   ;;  %s1442_s24 = sphi %s1510_s24, %s1970_s24   ;;  %s1438_s23 = sphi %s1508_s23, %s1962_s23   ;;  %s1434_s22 = sphi %s1506_s22, %s1969_s22   ;;  %s1430_s21 = sphi %s1504_s21, %s1968_s21   ;;  %s1426_s20 = sphi %s1502_s20, %s1960_s20   ;;  %s1422_s19 = sphi %s1500_s19, %s1967_s19   ;;  %s1418_s18 = sphi %s1498_s18, %s1966_s18  }
  0x13   : > { %1930 = sst [smem:[#allocation17_spill]] %s1430_s21  ;;  %s72_s29 = sadd.s32 1, %s1426_s20 }
  0x14   : > { %1931 = sst [smem:[#allocation18_spill]] %s1438_s23  ;;  %p79_p1 = scmp.ne.s32.totalorder %s1426_s20, %s1422_s19 }
  0x15   : > { %1932 = sst [smem:[#allocation19_spill]] %s1446_s25  ;;  %p85_p2 = scmp.ne.s32.totalorder %s1422_s19, %s1418_s18 }
  0x16   : > { %1933 = sst [smem:[#allocation20_spill]] %s1454_s27  ;;  %p1913_p3 = scmp.lt.s32.totalorder %s1458_s28, 4 }
  0x17   : > { %1934 = sst [smem:[#allocation21_spill]] %s1458_s28  ;;  %p81_p4 = por %p79_p1, %p54_p0 }
  0x18   : > { %s233_s30 = sand.u32 1, %s1458_s28   ;;  %s1564_s6 = sand.u32 1, %s1426_s20  }
  0x19   : > { %s1911_s7 = sshll.u32 %s1564_s6, 8  ;;  %s1079_s8 = sshll.u32 %s1450_s26, 4 }
  0x1a   : > { %s1935_s1 = sld [smem:[#allocation29_spill]]  ;;  %s237_s13 = scalar_lea.vmem [#allocation6], %s1911_s7 }
  0x1b   : > { %s245_s14 = sshll.u32 %s237_s13, 4  ;;  %p1575_p5 = pnand %p1913_p3, %p81_p4  ;;  %s246_s14 = int_to_ptr.vmem [resolvable:$true] %s245_s14 }
  0x1c   : > { %p1065_p6 = scmp.ge.s32.totalorder %s1458_s28, 1  ;;  %s1580_s16 = scalar_lea.sflag [#allocation7], %s233_s30 }
  0x1d   : > { %s1460_s17 = smov 512   ;;  %s1462_s9 = smov 16  }
  0x1e   : > { %p294_p7 = scmp.lt.s32.totalorder %s1458_s28, 5  ;;  %s1591_s30 = sadd.s32 4294967295, %s1458_s28  }
  0x1f   : > { %s36_s13 = sadd.s32 1, %s1450_s26  ;;  %s39_s7 = sadd.s32 1, %s1454_s27 }
  0x20   : > { %s242_s11 = scalar_lea.hbm %s1935_s1, %s1079_s8  ;;  %s1461_s8 = smov 256  }
  0x21   : > { %s243_s12 = sshll.u32 %s242_s11, 4  ;;  %p1586_p8 = pnand %p1065_p6, %p294_p7  ;;  %s244_s12 = int_to_ptr.hbm [resolvable:$true] %s243_s12 }
  0x22   : > { %1098 = dma.hbm_to_vmem [thread:$0]  (!%p1575_p5), %s244_s12, 4096, %s246_s14, %s1580_s16, %s1460_s17, %s1461_s8, %s1462_s9  }
  0x23   : > { %s1051_s11 = sadd.s32 4294967294, %s1458_s28   ;;  %p37_p9 = scmp.ge.s32.totalorder %s36_s13, 2 }
  0x24   : > { %s46_s12 = sadd.s32 1, %s1438_s23  ;;  %p53_p10 = scmp.ne.s32.totalorder %s1438_s23, %s1434_s22 }
  0x25   : > { %p59_p11 = scmp.ne.s32.totalorder %s1434_s22, %s1430_s21  ;;  %s1973_s13 = smov (%p37_p9, %s36_s13), 0 }
  0x26   : > { %1938 = sst [smem:[#allocation22_spill]] %s1973_s13  ;;  %s1975_s7 = smov (!%p37_p9, %s39_s7), %s1454_s27 }
  0x27   : > { %p1609_p12 = por %p54_p0, %p53_p10  ;;  %p60_p13 = scmp.eq.s32.totalorder %s1591_s30, 0 }
  0x28   : > { %p41_p1 = scmp.ge.s32.totalorder %s1975_s7, 2  ;;  %s69_s17 = ssub.s32 %s1450_s26, %s1973_s13 }
  0x29   : > { %p1619_p4 = por %p60_p13, %p59_p11  ;;  %p70_p6 = scmp.eq.s32.totalorder %s69_s17, 0 }
  0x2a   : > { %s1977_s7 = smov (%p41_p1, %s1975_s7), 0  ;;  %p1635_p0 = por %p85_p2, %p60_p13 }
  0x2b   : > { %1941 = sst [smem:[#allocation23_spill]] %s1977_s7  ;;  %s43_s1 = ssub.s32 %s1454_s27, %s1977_s7 }
  0x2c   : > { %s1628_s9 = scalar_select %p70_p6, %s1426_s20, %s72_s29  }
  0x2d   : > { %p44_p7 = scmp.eq.s32.totalorder %s43_s1, 0  ;;  %p182_p9 = scmp.eq.s32.totalorder %s1591_s30, 3 }
  0x2e   : > { %1942 = sst [smem:[#allocation24_spill]] %s1628_s9  ;;  %p188_p3 = scmp.eq.s32.totalorder %s1051_s11, 3 }
  0x2f   : > { %s211_s13 = sand.u32 1, %s1438_s23   ;;  %p1647_p1 = por %p182_p9, %p53_p10 }
  0x30   : > { %s1642_s17 = scalar_select %p44_p7, %s1438_s23, %s46_s12  }
  0x31   : > { %s1945_s25 = scalar_select %p1647_p1, 1, 0 }
  0x32   : > { %1944 = sst [smem:[#allocation25_spill]] %s1642_s17  ;;  %p1654_p2 = por %p188_p3, %p59_p11 }
  0x33   : > { %1946 = sst [smem:[#allocation26_spill]] %s1945_s25  ;;  %s1054_s29 = sshll.u32 %s211_s13, 7 }
  0x34   : > { %s1947_s18 = scalar_select %p1654_p2, 1, 0 }
  0x35   : > { %s1078_s7 = sshll.u32 %s1454_s27, 7  ;;  %s1949_s0 = sld [smem:[#allocation28_spill]] }
  0x36   : > { %1948 = sst [smem:[#allocation27_spill]] %s1947_s18  ;;  %s215_s20 = scalar_lea.vmem [#allocation3], %s1054_s29 }
  0x37   : > { %s223_s12 = sshll.u32 %s215_s20, 4  ;;  %p1950_p10 = scmp.lt.s32.totalorder %s1458_s28, 4  ;;  %s224_s12 = int_to_ptr.vmem [resolvable:$true] %s223_s12 }
  0x38   : > { %s1060_s23 = sshll.u32 %s1564_s6, 1  ;;  %s212_s18 = scalar_lea.sflag [#allocation4], %s211_s13 }
  0x39   : > { %p1093_p3 = pnand %p1950_p10, %p1609_p12  ;;  %s1463_s21 = smov 128  }
  0x3a   : > { %s1464_s27 = smov 8   ;;  %s1061_s9 = sshll.u32 %s1450_s26, 1 }
  0x3b   : > { %s220_s11 = scalar_lea.hbm %s1949_s0, %s1078_s7  ;;  %s263_s20 = scalar_lea.hbm %s1907_s2, %s1061_s9 }
  0x3c   : > { %s221_s17 = sshll.u32 %s220_s11, 4  ;;  %s259_s1 = scalar_lea.vmem [#allocation8], %s1060_s23  ;;  %s222_s17 = int_to_ptr.hbm [resolvable:$true] %s221_s17 }
  0x3d   : > { %1095 = dma.hbm_to_vmem [thread:$0]  (!%p1093_p3), %s222_s17, 2048, %s224_s12, %s212_s18, %s1463_s21, %s1463_s21, %s1464_s27  }
  0x3e   : > { %s267_s11 = sshll.u32 %s259_s1, 4  ;;  %s265_s0 = sshll.u32 %s263_s20, 4  ;;  %s268_s11 = int_to_ptr.vmem [resolvable:$true] %s267_s11  ;;  %s266_s0 = int_to_ptr.hbm [resolvable:$true] %s265_s0 }
  0x3f   : > { %1101 = dma.hbm_to_vmem [thread:$0]  (!%p1575_p5), %s266_s0, 32, %s268_s11, %s1580_s16  }
  0x40   : > { %s1080_s14 = sshll.u32 %s1450_s26, 8  ;;  %s1951_s17 = sshll.u32 %s1564_s6, 8 }
  0x41   : > { %s283_s25 = scalar_lea.hbm %s1908_s3, %s1080_s14  ;;  %s278_s18 = scalar_lea.vmem [#allocation9], %s1951_s17 }
  0x42   : > { %s286_s12 = sshll.u32 %s278_s18, 4  ;;  %s284_s4 = sshll.u32 %s283_s25, 4  ;;  %s287_s12 = int_to_ptr.vmem [resolvable:$true] %s286_s12  ;;  %s285_s4 = int_to_ptr.hbm [resolvable:$true] %s284_s4 }
  0x43   : > { %s275_s7 = scalar_lea.sflag [#allocation10], %s1564_s6  ;;  %298 = sbr.rel (%p1586_p8) target bundleno = 564 (0x234), region = 40 }
  0x44   : > { %1104 = dma.hbm_to_vmem [thread:$0]  (!%p1575_p5), %s285_s4, 4096, %s287_s12, %s275_s7, %s1463_s21, %s1463_s21, %s1464_s27  }
  0x45   : > { %s1686_s0 = sand.u32 (!%p1586_p8), 1, %s1434_s22  }
  0x46   : > { %s1066_s23 = sshll.u32 (!%p1586_p8), %s1686_s0, 7  ;;  %s301_s28 = scalar_lea.sflag (!%p1586_p8), [#allocation4], %s1686_s0 }
  0x47   : > { %s1690_s16 = scalar_lea.vmem (!%p1586_p8), [#allocation3], %s1066_s23 }
  0x48   : > { %1401 = dma.done.wait (%p1619_p4), %s301_s28, 2048  }
  0x49   : > { %1403 = vsyncadd (%p1619_p4), %s301_s28, 4294965248  ;;  %s310_s4 = sand.u32 1, %s1591_s30   ;;  %s312_s21 = sand.u32 1, %s1422_s19  }
  0x4a   : > { %s1067_s25 = sshll.u32 %s312_s21, 8  ;;  %s311_s27 = scalar_lea.sflag [#allocation7], %s310_s4 }
  0x4b   : > { %s1698_s6 = scalar_lea.vmem [#allocation6], %s1067_s25 }
  0x4c   : > { %1405 = dma.done.wait (%p1635_p0), %s311_s27, 4128  }
  0x4d   : > { %1407 = vsyncadd (%p1635_p0), %s311_s27, 4294963168  ;;  %s1068_s15 = sshll.u32 %s312_s21, 1  ;;  %s331_s8 = scalar_lea.sflag [#allocation10], %s312_s21 }
  0x4e   : > { %s1704_s10 = scalar_lea.vmem [#allocation8], %s1068_s15  ;;  %s1706_s9 = scalar_lea.vmem [#allocation9], %s1067_s25 }
  0x4f   : > { %1409 = dma.done.wait (%p1635_p0), %s331_s8, 4096  }
  0x50   : > { %1411 = vsyncadd (%p1635_p0), %s331_s8, 4294963200  ;;  %s1712_s30 = scalar_lea.vmem [#allocation11], %s1066_s23  ;;  %p1071_p5 = scmp.ne.s32.totalorder %s1442_s24, 0 }
  0x52   : > { %385 = sbr.rel (%p1071_p5) target bundleno = 104 (0x68), region = 60 }
  0x57   : > { %v1465_v0 = vmov 0.0  }
  0x58   : > { %386 = vst [vmem:[#allocation2 + $0x30] sm:$0xff] %v1465_v0 }
  0x59   : > { %387 = vst [vmem:[#allocation2] sm:$0xff] %v1465_v0 }
  0x5a   : > { %388 = vst [vmem:[#allocation2 + $0x58] sm:$0xff] %v1465_v0 }
  0x5b   : > { %389 = vst [vmem:[#allocation2 + $0x18] sm:$0xff] %v1465_v0 }
  0x5c   : > { %390 = vst [vmem:[#allocation2 + $0x50] sm:$0xff] %v1465_v0 }
  0x5d   : > { %391 = vst [vmem:[#allocation2 + $0x68] sm:$0xff] %v1465_v0 }
  0x5e   : > { %392 = vst [vmem:[#allocation2 + $0x8] sm:$0xff] %v1465_v0 }
  0x5f   : > { %393 = vst [vmem:[#allocation2 + $0x48] sm:$0xff] %v1465_v0 }
  0x60   : > { %394 = vst [vmem:[#allocation2 + $0x40] sm:$0xff] %v1465_v0 }
  0x61   : > { %395 = vst [vmem:[#allocation2 + $0x20] sm:$0xff] %v1465_v0 }
  0x62   : > { %396 = vst [vmem:[#allocation2 + $0x10] sm:$0xff] %v1465_v0 }
  0x63   : > { %397 = vst [vmem:[#allocation2 + $0x38] sm:$0xff] %v1465_v0 }
  0x64   : > { %398 = vst [vmem:[#allocation2 + $0x60] sm:$0xff] %v1465_v0 }
  0x65   : > { %399 = vst [vmem:[#allocation2 + $0x70] sm:$0xff] %v1465_v0 }
  0x66   : > { %400 = vst [vmem:[#allocation2 + $0x78] sm:$0xff] %v1465_v0 }
  0x67   : > { %401 = vst [vmem:[#allocation2 + $0x28] sm:$0xff] %v1465_v0 }
  0x68 PF: > { %v448_v1 = vld [vmem:[%s1698_s6 + $0xf0] sm:$0xff]  ;;  %v449_v2 = vld [vmem:[%s1698_s6 + $0xf8] sm:$0xff]  ;;  %v446_v3 = vld [vmem:[%s1698_s6 + $0xe0] sm:$0xff]  ;;  %p1072_p8 = scmp.ne.s32.totalorder %s1442_s24, 1 }
  0x69   : > { %456 = vmatpush.msra.mxu0 %v448_v1  ;;  %521 = vmatpush.msra.mxu1 %v449_v2  ;;  %v447_v4 = vld [vmem:[%s1698_s6 + $0xe8] sm:$0xff]  ;;  %v444_v5 = vld [vmem:[%s1698_s6 + $0xd0] sm:$0xff]  ;;  %v445_v6 = vld [vmem:[%s1698_s6 + $0xd8] sm:$0xff]  ;;  %s1952_s20 = sld [smem:[#allocation30_spill]] (!%p1072_p8) }
  0x6a   : > { %v442_v7 = vld [vmem:[%s1698_s6 + $0xc0] sm:$0xff]  ;;  %v443_v8 = vld [vmem:[%s1698_s6 + $0xc8] sm:$0xff]  ;;  %v440_v9 = vld [vmem:[%s1698_s6 + $0xb0] sm:$0xff] }
  0x6b   : > { %457 = vmatpush.msra.mxu0 %v446_v3  ;;  %522 = vmatpush.msra.mxu1 %v447_v4  ;;  %v441_v10 = vld [vmem:[%s1698_s6 + $0xb8] sm:$0xff]  ;;  %v438_v11 = vld [vmem:[%s1698_s6 + $0xa0] sm:$0xff]  ;;  %v439_v12 = vld [vmem:[%s1698_s6 + $0xa8] sm:$0xff] }
  0x6c   : > { %v436_v13 = vld [vmem:[%s1698_s6 + $0x90] sm:$0xff]  ;;  %v437_v14 = vld [vmem:[%s1698_s6 + $0x98] sm:$0xff]  ;;  %v434_v15 = vld [vmem:[%s1698_s6 + $0x80] sm:$0xff] }
  0x6d   : > { %458 = vmatpush.msra.mxu0 %v444_v5  ;;  %523 = vmatpush.msra.mxu1 %v445_v6  ;;  %v435_v16 = vld [vmem:[%s1698_s6 + $0x88] sm:$0xff]  ;;  %v432_v17 = vld [vmem:[%s1698_s6 + $0x70] sm:$0xff]  ;;  %v433_v18 = vld [vmem:[%s1698_s6 + $0x78] sm:$0xff] }
  0x6e   : > { %v430_v19 = vld [vmem:[%s1698_s6 + $0x60] sm:$0xff]  ;;  %v431_v20 = vld [vmem:[%s1698_s6 + $0x68] sm:$0xff]  ;;  %v428_v21 = vld [vmem:[%s1698_s6 + $0x50] sm:$0xff] }
  0x6f   : > { %459 = vmatpush.msra.mxu0 %v442_v7  ;;  %524 = vmatpush.msra.mxu1 %v443_v8  ;;  %v429_v22 = vld [vmem:[%s1698_s6 + $0x58] sm:$0xff]  ;;  %v426_v23 = vld [vmem:[%s1698_s6 + $0x40] sm:$0xff]  ;;  %v427_v24 = vld [vmem:[%s1698_s6 + $0x48] sm:$0xff] }
  0x70   : > { %v424_v25 = vld [vmem:[%s1698_s6 + $0x30] sm:$0xff]  ;;  %v425_v26 = vld [vmem:[%s1698_s6 + $0x38] sm:$0xff]  ;;  %v422_v27 = vld [vmem:[%s1698_s6 + $0x20] sm:$0xff] }
  0x71   : > { %460 = vmatpush.msra.mxu0 %v440_v9  ;;  %525 = vmatpush.msra.mxu1 %v441_v10  ;;  %v423_v28 = vld [vmem:[%s1698_s6 + $0x28] sm:$0xff]  ;;  %v420_v29 = vld [vmem:[%s1698_s6 + $0x10] sm:$0xff]  ;;  %v421_v30 = vld [vmem:[%s1698_s6 + $0x18] sm:$0xff] }
  0x72   : > { %v418_v31 = vld [vmem:[%s1698_s6] sm:$0xff]  ;;  %v419_v32 = vld [vmem:[%s1698_s6 + $0x8] sm:$0xff]  ;;  %v404_v35 = vld [vmem:[%s1690_s16 + $0x10] sm:$0xff] }
  0x73   : > { %461 = vmatpush.msra.mxu0 %v438_v11  ;;  %526 = vmatpush.msra.mxu1 %v439_v12  ;;  %v402_v33 = vld [vmem:[%s1690_s16] sm:$0xff]  ;;  %v403_v34 = vld [vmem:[%s1690_s16 + $0x8] sm:$0xff]  ;;  %v405_v36 = vld [vmem:[%s1690_s16 + $0x18] sm:$0xff] }
  0x74   : > { %v406_v37 = vld [vmem:[%s1690_s16 + $0x20] sm:$0xff]  ;;  %v407_v38 = vld [vmem:[%s1690_s16 + $0x28] sm:$0xff]  ;;  %v408_v39 = vld [vmem:[%s1690_s16 + $0x30] sm:$0xff] }
  0x75   : > { %462 = vmatpush.msra.mxu0 %v436_v13  ;;  %527 = vmatpush.msra.mxu1 %v437_v14  ;;  %v409_v40 = vld [vmem:[%s1690_s16 + $0x38] sm:$0xff]  ;;  %v410_v41 = vld [vmem:[%s1690_s16 + $0x40] sm:$0xff]  ;;  %v647_v46 = vld [vmem:[%s1706_s9 + $0x68] sm:$0xff] }
  0x76   : > { %v649_v42 = vld [vmem:[%s1706_s9 + $0x78] sm:$0xff]  ;;  %v648_v44 = vld [vmem:[%s1706_s9 + $0x70] sm:$0xff]  ;;  %v663_v47 = vld [vmem:[%s1706_s9 + $0xe8] sm:$0xff] }
  0x77   : > { %463 = vmatpush.msra.mxu0 %v434_v15  ;;  %528 = vmatpush.msra.mxu1 %v435_v16  ;;  %v665_v43 = vld [vmem:[%s1706_s9 + $0xf8] sm:$0xff]  ;;  %v664_v45 = vld [vmem:[%s1706_s9 + $0xf0] sm:$0xff]  ;;  %v411_v48 = vld [vmem:[%s1690_s16 + $0x48] sm:$0xff] }
  0x78   : > { %666 = vmatpush.msra.mxu2 %v649_v42  ;;  %731 = vmatpush.msra.mxu3 %v665_v43  ;;  %v646_v49 = vld [vmem:[%s1706_s9 + $0x60] sm:$0xff]  ;;  %v645_v51 = vld [vmem:[%s1706_s9 + $0x58] sm:$0xff]  ;;  %v644_v53 = vld [vmem:[%s1706_s9 + $0x50] sm:$0xff] }
  0x79   : > { %464 = vmatpush.msra.mxu0 %v432_v17  ;;  %529 = vmatpush.msra.mxu1 %v433_v18  ;;  %v662_v50 = vld [vmem:[%s1706_s9 + $0xe0] sm:$0xff]  ;;  %v661_v52 = vld [vmem:[%s1706_s9 + $0xd8] sm:$0xff]  ;;  %v660_v54 = vld [vmem:[%s1706_s9 + $0xd0] sm:$0xff] }
  0x7a   : > { %667 = vmatpush.msra.mxu2 %v648_v44  ;;  %732 = vmatpush.msra.mxu3 %v664_v45  ;;  %v643_v55 = vld [vmem:[%s1706_s9 + $0x48] sm:$0xff]  ;;  %v642_v58 = vld [vmem:[%s1706_s9 + $0x40] sm:$0xff]  ;;  %v641_v60 = vld [vmem:[%s1706_s9 + $0x38] sm:$0xff] }
  0x7b   : > { %465 = vmatpush.msra.mxu0 %v430_v19  ;;  %530 = vmatpush.msra.mxu1 %v431_v20  ;;  %v659_v56 = vld [vmem:[%s1706_s9 + $0xc8] sm:$0xff]  ;;  %v658_v59 = vld [vmem:[%s1706_s9 + $0xc0] sm:$0xff]  ;;  %v657_v61 = vld [vmem:[%s1706_s9 + $0xb8] sm:$0xff] }
  0x7c   : > { %668 = vmatpush.msra.mxu2 %v647_v46  ;;  %733 = vmatpush.msra.mxu3 %v663_v47  ;;  %v412_v57 = vld [vmem:[%s1690_s16 + $0x50] sm:$0xff]  ;;  %v413_v2 = vld [vmem:[%s1690_s16 + $0x58] sm:$0xff]  ;;  %v638_v3 = vld [vmem:[%s1706_s9 + $0x20] sm:$0xff] }
  0x7d   : > { %466 = vmatpush.msra.mxu0 %v428_v21  ;;  %531 = vmatpush.msra.mxu1 %v429_v22  ;;  %v640_v62 = vld [vmem:[%s1706_s9 + $0x30] sm:$0xff]  ;;  %v639_v0 = vld [vmem:[%s1706_s9 + $0x28] sm:$0xff]  ;;  %v654_v4 = vld [vmem:[%s1706_s9 + $0xa0] sm:$0xff] }
  0x7e   : > { %669 = vmatpush.msra.mxu2 %v646_v49  ;;  %734 = vmatpush.msra.mxu3 %v662_v50  ;;  %v656_v63 = vld [vmem:[%s1706_s9 + $0xb0] sm:$0xff]  ;;  %v655_v1 = vld [vmem:[%s1706_s9 + $0xa8] sm:$0xff]  ;;  %v637_v5 = vld [vmem:[%s1706_s9 + $0x18] sm:$0xff] }
  0x7f   : > { %467 = vmatpush.msra.mxu0 %v426_v23  ;;  %532 = vmatpush.msra.mxu1 %v427_v24  ;;  %v653_v6 = vld [vmem:[%s1706_s9 + $0x98] sm:$0xff]  ;;  %v636_v7 = vld [vmem:[%s1706_s9 + $0x10] sm:$0xff]  ;;  %v635_v10 = vld [vmem:[%s1706_s9 + $0x8] sm:$0xff] }
  0x80   : > { %670 = vmatpush.msra.mxu2 %v645_v51  ;;  %735 = vmatpush.msra.mxu3 %v661_v52  ;;  %v652_v8 = vld [vmem:[%s1706_s9 + $0x90] sm:$0xff]  ;;  %v414_v9 = vld [vmem:[%s1690_s16 + $0x60] sm:$0xff]  ;;  %v651_v11 = vld [vmem:[%s1706_s9 + $0x88] sm:$0xff] }
  0x81   : > { %468 = vmatpush.msra.mxu0 %v424_v25  ;;  %533 = vmatpush.msra.mxu1 %v425_v26  ;;  %v634_v12 = vld [vmem:[%s1706_s9] sm:$0xff]  ;;  %v416_v15 = vld [vmem:[%s1690_s16 + $0x70] sm:$0xff]  ;;  %v417_v16 = vld [vmem:[%s1690_s16 + $0x78] sm:$0xff] }
  0x82   : > { %671 = vmatpush.msra.mxu2 %v644_v53  ;;  %736 = vmatpush.msra.mxu3 %v660_v54  ;;  %v650_v13 = vld [vmem:[%s1706_s9 + $0x80] sm:$0xff]  ;;  %v450_v17 = vld [vmem:[%s1704_s10] sm:$0x3] }
  0x83   : > { %469 = vmatpush.msra.mxu0 %v422_v27  ;;  %534 = vmatpush.msra.mxu1 %v423_v28  ;;  %v415_v14 = vld [vmem:[%s1690_s16 + $0x68] sm:$0xff]  ;;  %v1796_v18 = vperm.slane %v450_v17, 0  ;;  %v1798_v19 = vperm.slane %v450_v17, 1 }
  0x84   : > { %672 = vmatpush.msra.mxu2 %v643_v55  ;;  %737 = vmatpush.msra.mxu3 %v659_v56 }
  0x85   : > { %470 = vmatpush.msra.mxu0 %v420_v29  ;;  %535 = vmatpush.msra.mxu1 %v421_v30 }
  0x86   : > { %673 = vmatpush.msra.mxu2 %v642_v58  ;;  %738 = vmatpush.msra.mxu3 %v658_v59 }
  0x87   : > { %471 = vmatpush.msra.mxu0 %v418_v31  ;;  %536 = vmatpush.msra.mxu1 %v419_v32 }
  0x88   : > { %472 = vmatmul.f32.vlgmr.msra.gmra.mxu0 %v402_v33  ;;  %537 = vmatmul.f32.vlgmr.msra.gmra.mxu1 %v402_v33 }
  0x89   : > { %674 = vmatpush.msra.mxu2 %v641_v60  ;;  %739 = vmatpush.msra.mxu3 %v657_v61 }
  0x8b   : > { %675 = vmatpush.msra.mxu2 %v640_v62  ;;  %740 = vmatpush.msra.mxu3 %v656_v63 }
  0x8d   : > { %676 = vmatpush.msra.mxu2 %v639_v0  ;;  %741 = vmatpush.msra.mxu3 %v655_v1 }
  0x8f   : > { %677 = vmatpush.msra.mxu2 %v638_v3  ;;  %742 = vmatpush.msra.mxu3 %v654_v4 }
  0x90   : > { %475 = vmatmul.f32.gmra.mxu0 %v403_v34  ;;  %540 = vmatmul.f32.gmra.mxu1 %v403_v34 }
  0x91   : > { %678 = vmatpush.msra.mxu2 %v637_v5  ;;  %743 = vmatpush.msra.mxu3 %v653_v6 }
  0x93   : > { %679 = vmatpush.msra.mxu2 %v636_v7  ;;  %744 = vmatpush.msra.mxu3 %v652_v8 }
  0x95   : > { %680 = vmatpush.msra.mxu2 %v635_v10  ;;  %745 = vmatpush.msra.mxu3 %v651_v11 }
  0x97   : > { %681 = vmatpush.msra.mxu2 %v634_v12  ;;  %746 = vmatpush.msra.mxu3 %v650_v13 }
  0x98   : > { %478 = vmatmul.f32.gmra.mxu0 %v404_v35  ;;  %543 = vmatmul.f32.gmra.mxu1 %v404_v35 }
  0xa0   : > { %481 = vmatmul.f32.gmra.mxu0 %v405_v36  ;;  %546 = vmatmul.f32.gmra.mxu1 %v405_v36 }
  0xa8   : > { %484 = vmatmul.f32.gmra.mxu0 %v406_v37  ;;  %549 = vmatmul.f32.gmra.mxu1 %v406_v37 }
  0xb0   : > { %487 = vmatmul.f32.gmra.mxu0 %v407_v38  ;;  %552 = vmatmul.f32.gmra.mxu1 %v407_v38 }
  0xb8   : > { %490 = vmatmul.f32.gmra.mxu0 %v408_v39  ;;  %555 = vmatmul.f32.gmra.mxu1 %v408_v39 }
  0xc0   : > { %493 = vmatmul.f32.gmra.mxu0 %v409_v40  ;;  %558 = vmatmul.f32.gmra.mxu1 %v409_v40 }
  0xc8   : > { %496 = vmatmul.f32.gmra.mxu0 %v410_v41  ;;  %561 = vmatmul.f32.gmra.mxu1 %v410_v41 }
  0xd0   : > { %499 = vmatmul.f32.gmra.mxu0 %v411_v48  ;;  %564 = vmatmul.f32.gmra.mxu1 %v411_v48 }
  0xd8   : > { %502 = vmatmul.f32.gmra.mxu0 %v412_v57  ;;  %567 = vmatmul.f32.gmra.mxu1 %v412_v57 }
  0xe0   : > { %505 = vmatmul.f32.gmra.mxu0 %v413_v2  ;;  %570 = vmatmul.f32.gmra.mxu1 %v413_v2 }
  0xe8   : > { %508 = vmatmul.f32.gmra.mxu0 %v414_v9  ;;  %573 = vmatmul.f32.gmra.mxu1 %v414_v9 }
  0xf0   : > { %511 = vmatmul.f32.gmra.mxu0 %v415_v14  ;;  %576 = vmatmul.f32.gmra.mxu1 %v415_v14 }
  0xf8   : > { %514 = vmatmul.f32.gmra.mxu0 %v416_v15  ;;  %579 = vmatmul.f32.gmra.mxu1 %v416_v15 }
 0x100   : > { %517 = vmatmul.f32.gmra.mxu0 %v417_v16  ;;  %582 = vmatmul.f32.gmra.mxu1 %v417_v16 }
 0x105   : > { %v473_v20 = vpop.f32.mrf.mxu0  ;;  %v538_v21 = vpop.f32.mrf.mxu1 }
 0x106   : > { %v474_v22 = vadd.f32 %v473_v20, %v1796_v18  ;;  %v539_v23 = vadd.f32 %v538_v21, %v1798_v19 }
 0x108   : > { %v586_v24 = vmax.f32 %v474_v22, 0.0  ;;  %v587_v25 = vmax.f32 %v539_v23, 0.0 }
 0x10a   : > { %682 = vmatmul.f32.vlgmr.msra.gmra.mxu2 %v586_v24  ;;  %747 = vmatmul.f32.vlgmr.msra.gmra.mxu3 %v587_v25 }
 0x10d   : > { %v476_v26 = vpop.f32.mrf.mxu0  ;;  %v541_v27 = vpop.f32.mrf.mxu1 }
 0x10e   : > { %v477_v28 = vadd.f32 %v476_v26, %v1796_v18  ;;  %v542_v29 = vadd.f32 %v541_v27, %v1798_v19 }
 0x110   : > { %v588_v30 = vmax.f32 %v477_v28, 0.0  ;;  %v589_v31 = vmax.f32 %v542_v29, 0.0 }
 0x112   : > { %685 = vmatmul.f32.gmra.mxu2 %v588_v30  ;;  %750 = vmatmul.f32.gmra.mxu3 %v589_v31 }
 0x115   : > { %v479_v32 = vpop.f32.mrf.mxu0  ;;  %v544_v33 = vpop.f32.mrf.mxu1 }
 0x116   : > { %v480_v34 = vadd.f32 %v479_v32, %v1796_v18  ;;  %v545_v35 = vadd.f32 %v544_v33, %v1798_v19 }
 0x118   : > { %v590_v36 = vmax.f32 %v480_v34, 0.0  ;;  %v591_v37 = vmax.f32 %v545_v35, 0.0 }
 0x11a   : > { %688 = vmatmul.f32.gmra.mxu2 %v590_v36  ;;  %753 = vmatmul.f32.gmra.mxu3 %v591_v37 }
 0x11d   : > { %v482_v38 = vpop.f32.mrf.mxu0  ;;  %v547_v39 = vpop.f32.mrf.mxu1 }
 0x11e   : > { %v483_v40 = vadd.f32 %v482_v38, %v1796_v18  ;;  %v548_v41 = vadd.f32 %v547_v39, %v1798_v19 }
 0x120   : > { %v592_v42 = vmax.f32 %v483_v40, 0.0  ;;  %v593_v43 = vmax.f32 %v548_v41, 0.0 }
 0x122   : > { %691 = vmatmul.f32.gmra.mxu2 %v592_v42  ;;  %756 = vmatmul.f32.gmra.mxu3 %v593_v43 }
 0x125   : > { %v485_v44 = vpop.f32.mrf.mxu0  ;;  %v550_v45 = vpop.f32.mrf.mxu1 }
 0x126   : > { %v486_v46 = vadd.f32 %v485_v44, %v1796_v18  ;;  %v551_v47 = vadd.f32 %v550_v45, %v1798_v19 }
 0x128   : > { %v594_v48 = vmax.f32 %v486_v46, 0.0  ;;  %v595_v49 = vmax.f32 %v551_v47, 0.0 }
 0x12a   : > { %694 = vmatmul.f32.gmra.mxu2 %v594_v48  ;;  %759 = vmatmul.f32.gmra.mxu3 %v595_v49 }
 0x12d   : > { %v488_v50 = vpop.f32.mrf.mxu0  ;;  %v553_v51 = vpop.f32.mrf.mxu1 }
 0x12e   : > { %v489_v52 = vadd.f32 %v488_v50, %v1796_v18  ;;  %v554_v53 = vadd.f32 %v553_v51, %v1798_v19 }
 0x130   : > { %v596_v54 = vmax.f32 %v489_v52, 0.0  ;;  %v597_v55 = vmax.f32 %v554_v53, 0.0 }
 0x132   : > { %697 = vmatmul.f32.gmra.mxu2 %v596_v54  ;;  %762 = vmatmul.f32.gmra.mxu3 %v597_v55  ;;  %v618_v55 = vld [vmem:[#allocation2 + $0x30] sm:$0xff] }
 0x135   : > { %v491_v56 = vpop.f32.mrf.mxu0  ;;  %v556_v57 = vpop.f32.mrf.mxu1 }
 0x136   : > { %v492_v58 = vadd.f32 %v491_v56, %v1796_v18  ;;  %v557_v59 = vadd.f32 %v556_v57, %v1798_v19 }
 0x138   : > { %v598_v60 = vmax.f32 %v492_v58, 0.0  ;;  %v599_v61 = vmax.f32 %v557_v59, 0.0 }
 0x13a   : > { %700 = vmatmul.f32.gmra.mxu2 %v598_v60  ;;  %765 = vmatmul.f32.gmra.mxu3 %v599_v61  ;;  %v619_v60 = vld [vmem:[#allocation2] sm:$0xff] }
 0x13d   : > { %v494_v62 = vpop.f32.mrf.mxu0  ;;  %v559_v63 = vpop.f32.mrf.mxu1 }
 0x13e   : > { %v495_v0 = vadd.f32 %v494_v62, %v1796_v18  ;;  %v560_v1 = vadd.f32 %v559_v63, %v1798_v19 }
 0x140   : > { %v600_v2 = vmax.f32 %v495_v0, 0.0  ;;  %v601_v3 = vmax.f32 %v560_v1, 0.0 }
 0x142   : > { %703 = vmatmul.f32.gmra.mxu2 %v600_v2  ;;  %768 = vmatmul.f32.gmra.mxu3 %v601_v3 }
 0x145   : > { %v497_v4 = vpop.f32.mrf.mxu0  ;;  %v562_v5 = vpop.f32.mrf.mxu1 }
 0x146   : > { %v498_v6 = vadd.f32 %v497_v4, %v1796_v18  ;;  %v563_v7 = vadd.f32 %v562_v5, %v1798_v19  ;;  %v621_v4 = vld [vmem:[#allocation2 + $0x18] sm:$0xff] }
 0x148   : > { %v602_v8 = vmax.f32 %v498_v6, 0.0  ;;  %v603_v9 = vmax.f32 %v563_v7, 0.0 }
 0x14a   : > { %706 = vmatmul.f32.gmra.mxu2 %v602_v8  ;;  %771 = vmatmul.f32.gmra.mxu3 %v603_v9  ;;  %v622_v9 = vld [vmem:[#allocation2 + $0x50] sm:$0xff] }
 0x14d   : > { %v500_v10 = vpop.f32.mrf.mxu0  ;;  %v565_v11 = vpop.f32.mrf.mxu1 }
 0x14e   : > { %v501_v12 = vadd.f32 %v500_v10, %v1796_v18  ;;  %v566_v13 = vadd.f32 %v565_v11, %v1798_v19 }
 0x150   : > { %v604_v14 = vmax.f32 %v501_v12, 0.0  ;;  %v605_v15 = vmax.f32 %v566_v13, 0.0 }
 0x152   : > { %709 = vmatmul.f32.gmra.mxu2 %v604_v14  ;;  %774 = vmatmul.f32.gmra.mxu3 %v605_v15  ;;  %v623_v14 = vld [vmem:[#allocation2 + $0x68] sm:$0xff] }
 0x155   : > { %v503_v16 = vpop.f32.mrf.mxu0  ;;  %v568_v17 = vpop.f32.mrf.mxu1 }
 0x156   : > { %v504_v20 = vadd.f32 %v503_v16, %v1796_v18  ;;  %v569_v21 = vadd.f32 %v568_v17, %v1798_v19 }
 0x158   : > { %v606_v22 = vmax.f32 %v504_v20, 0.0  ;;  %v607_v23 = vmax.f32 %v569_v21, 0.0  ;;  %v624_v21 = vld [vmem:[#allocation2 + $0x8] sm:$0xff] }
 0x15a   : > { %712 = vmatmul.f32.gmra.mxu2 %v606_v22  ;;  %777 = vmatmul.f32.gmra.mxu3 %v607_v23 }
 0x15d   : > { %v506_v24 = vpop.f32.mrf.mxu0  ;;  %v571_v25 = vpop.f32.mrf.mxu1 }
 0x15e   : > { %v507_v26 = vadd.f32 %v506_v24, %v1796_v18  ;;  %v572_v27 = vadd.f32 %v571_v25, %v1798_v19 }
 0x160   : > { %v608_v28 = vmax.f32 %v507_v26, 0.0  ;;  %v609_v29 = vmax.f32 %v572_v27, 0.0  ;;  %v625_v26 = vld [vmem:[#allocation2 + $0x48] sm:$0xff] }
 0x162   : > { %715 = vmatmul.f32.gmra.mxu2 %v608_v28  ;;  %780 = vmatmul.f32.gmra.mxu3 %v609_v29 }
 0x165   : > { %v509_v30 = vpop.f32.mrf.mxu0  ;;  %v574_v31 = vpop.f32.mrf.mxu1 }
 0x166   : > { %v510_v32 = vadd.f32 %v509_v30, %v1796_v18  ;;  %v575_v33 = vadd.f32 %v574_v31, %v1798_v19  ;;  %v626_v31 = vld [vmem:[#allocation2 + $0x40] sm:$0xff] }
 0x168   : > { %v610_v34 = vmax.f32 %v510_v32, 0.0  ;;  %v611_v35 = vmax.f32 %v575_v33, 0.0 }
 0x16a   : > { %718 = vmatmul.f32.gmra.mxu2 %v610_v34  ;;  %783 = vmatmul.f32.gmra.mxu3 %v611_v35 }
 0x16d   : > { %v512_v36 = vpop.f32.mrf.mxu0  ;;  %v577_v37 = vpop.f32.mrf.mxu1 }
 0x16e   : > { %v513_v38 = vadd.f32 %v512_v36, %v1796_v18  ;;  %v578_v39 = vadd.f32 %v577_v37, %v1798_v19  ;;  %v627_v36 = vld [vmem:[#allocation2 + $0x20] sm:$0xff] }
 0x170   : > { %v612_v40 = vmax.f32 %v513_v38, 0.0  ;;  %v613_v41 = vmax.f32 %v578_v39, 0.0 }
 0x172   : > { %721 = vmatmul.f32.gmra.mxu2 %v612_v40  ;;  %786 = vmatmul.f32.gmra.mxu3 %v613_v41  ;;  %v628_v41 = vld [vmem:[#allocation2 + $0x10] sm:$0xff] }
 0x175   : > { %v515_v42 = vpop.f32.mrf.mxu0  ;;  %v580_v43 = vpop.f32.mrf.mxu1 }
 0x176   : > { %v516_v44 = vadd.f32 %v515_v42, %v1796_v18  ;;  %v581_v45 = vadd.f32 %v580_v43, %v1798_v19 }
 0x178   : > { %v614_v46 = vmax.f32 %v516_v44, 0.0  ;;  %v615_v47 = vmax.f32 %v581_v45, 0.0 }
 0x17a   : > { %724 = vmatmul.f32.gmra.mxu2 %v614_v46  ;;  %789 = vmatmul.f32.gmra.mxu3 %v615_v47  ;;  %v629_v46 = vld [vmem:[#allocation2 + $0x38] sm:$0xff] }
 0x17d   : > { %v518_v48 = vpop.f32.mrf.mxu0  ;;  %v583_v49 = vpop.f32.mrf.mxu1 }
 0x17e   : > { %v519_v50 = vadd.f32 %v518_v48, %v1796_v18  ;;  %v584_v51 = vadd.f32 %v583_v49, %v1798_v19  ;;  %v620_v18 = vld [vmem:[#allocation2 + $0x58] sm:$0xff] }
 0x180   : > { %v616_v52 = vmax.f32 %v519_v50, 0.0  ;;  %v617_v53 = vmax.f32 %v584_v51, 0.0  ;;  %v630_v51 = vld [vmem:[#allocation2 + $0x60] sm:$0xff] }
 0x182   : > { %727 = vmatmul.f32.gmra.mxu2 %v616_v52  ;;  %792 = vmatmul.f32.gmra.mxu3 %v617_v53 }
 0x18d   : > { %v683_v54 = vpop.f32.mrf.mxu2  ;;  %v748_v56 = vpop.f32.mrf.mxu3 }
 0x18e   : > { %v749_v57 = vadd.f32 %v748_v56, %v683_v54  ;;  %v631_v56 = vld [vmem:[#allocation2 + $0x70] sm:$0xff] }
 0x190   : > { %v796_v58 = vadd.f32 %v749_v57, %v618_v55 }
 0x192   : > { %812 = vst [vmem:[#allocation2 + $0x30] sm:$0xff] %v796_v58 }
 0x195   : > { %v686_v59 = vpop.f32.mrf.mxu2  ;;  %v751_v61 = vpop.f32.mrf.mxu3 }
 0x196   : > { %v752_v62 = vadd.f32 %v751_v61, %v686_v59  ;;  %v632_v61 = vld [vmem:[#allocation2 + $0x78] sm:$0xff] }
 0x198   : > { %v797_v63 = vadd.f32 %v752_v62, %v619_v60 }
 0x19a   : > { %813 = vst [vmem:[#allocation2] sm:$0xff] %v797_v63 }
 0x19d   : > { %v689_v0 = vpop.f32.mrf.mxu2  ;;  %v754_v1 = vpop.f32.mrf.mxu3 }
 0x19e   : > { %v755_v19 = vadd.f32 %v754_v1, %v689_v0  ;;  %v633_v1 = vld [vmem:[#allocation2 + $0x28] sm:$0xff] }
 0x1a0   : > { %v798_v2 = vadd.f32 %v755_v19, %v620_v18 }
 0x1a2   : > { %814 = vst [vmem:[#allocation2 + $0x58] sm:$0xff] %v798_v2 }
 0x1a5   : > { %v692_v3 = vpop.f32.mrf.mxu2  ;;  %v757_v5 = vpop.f32.mrf.mxu3 }
 0x1a6   : > { %v758_v6 = vadd.f32 %v757_v5, %v692_v3 }
 0x1a8   : > { %v799_v7 = vadd.f32 %v758_v6, %v621_v4 }
 0x1aa   : > { %815 = vst [vmem:[#allocation2 + $0x18] sm:$0xff] %v799_v7 }
 0x1ad   : > { %v695_v8 = vpop.f32.mrf.mxu2  ;;  %v760_v10 = vpop.f32.mrf.mxu3 }
 0x1ae   : > { %v761_v11 = vadd.f32 %v760_v10, %v695_v8 }
 0x1b0   : > { %v800_v12 = vadd.f32 %v761_v11, %v622_v9 }
 0x1b2   : > { %816 = vst [vmem:[#allocation2 + $0x50] sm:$0xff] %v800_v12 }
 0x1b5   : > { %v698_v13 = vpop.f32.mrf.mxu2  ;;  %v763_v15 = vpop.f32.mrf.mxu3 }
 0x1b6   : > { %v764_v16 = vadd.f32 %v763_v15, %v698_v13 }
 0x1b8   : > { %v801_v17 = vadd.f32 %v764_v16, %v623_v14 }
 0x1ba   : > { %817 = vst [vmem:[#allocation2 + $0x68] sm:$0xff] %v801_v17 }
 0x1bd   : > { %v701_v20 = vpop.f32.mrf.mxu2  ;;  %v766_v22 = vpop.f32.mrf.mxu3 }
 0x1be   : > { %v767_v23 = vadd.f32 %v766_v22, %v701_v20 }
 0x1c0   : > { %v802_v24 = vadd.f32 %v767_v23, %v624_v21 }
 0x1c2   : > { %818 = vst [vmem:[#allocation2 + $0x8] sm:$0xff] %v802_v24 }
 0x1c5   : > { %v704_v25 = vpop.f32.mrf.mxu2  ;;  %v769_v27 = vpop.f32.mrf.mxu3 }
 0x1c6   : > { %v770_v28 = vadd.f32 %v769_v27, %v704_v25 }
 0x1c8   : > { %v803_v29 = vadd.f32 %v770_v28, %v625_v26 }
 0x1ca   : > { %819 = vst [vmem:[#allocation2 + $0x48] sm:$0xff] %v803_v29 }
 0x1cd   : > { %v707_v30 = vpop.f32.mrf.mxu2  ;;  %v772_v32 = vpop.f32.mrf.mxu3 }
 0x1ce   : > { %v773_v33 = vadd.f32 %v772_v32, %v707_v30 }
 0x1d0   : > { %v804_v34 = vadd.f32 %v773_v33, %v626_v31 }
 0x1d2   : > { %820 = vst [vmem:[#allocation2 + $0x40] sm:$0xff] %v804_v34 }
 0x1d5   : > { %v710_v35 = vpop.f32.mrf.mxu2  ;;  %v775_v37 = vpop.f32.mrf.mxu3 }
 0x1d6   : > { %v776_v38 = vadd.f32 %v775_v37, %v710_v35 }
 0x1d8   : > { %v805_v39 = vadd.f32 %v776_v38, %v627_v36 }
 0x1da   : > { %821 = vst [vmem:[#allocation2 + $0x20] sm:$0xff] %v805_v39 }
 0x1dd   : > { %v713_v40 = vpop.f32.mrf.mxu2  ;;  %v778_v42 = vpop.f32.mrf.mxu3 }
 0x1de   : > { %v779_v43 = vadd.f32 %v778_v42, %v713_v40 }
 0x1e0   : > { %v806_v44 = vadd.f32 %v779_v43, %v628_v41 }
 0x1e2   : > { %822 = vst [vmem:[#allocation2 + $0x10] sm:$0xff] %v806_v44 }
 0x1e5   : > { %v716_v45 = vpop.f32.mrf.mxu2  ;;  %v781_v47 = vpop.f32.mrf.mxu3 }
 0x1e6   : > { %v782_v48 = vadd.f32 %v781_v47, %v716_v45 }
 0x1e8   : > { %v807_v49 = vadd.f32 %v782_v48, %v629_v46 }
 0x1ea   : > { %823 = vst [vmem:[#allocation2 + $0x38] sm:$0xff] %v807_v49 }
 0x1ed   : > { %v719_v50 = vpop.f32.mrf.mxu2  ;;  %v784_v52 = vpop.f32.mrf.mxu3 }
 0x1ee   : > { %v785_v53 = vadd.f32 %v784_v52, %v719_v50 }
 0x1f0   : > { %v808_v54 = vadd.f32 %v785_v53, %v630_v51 }
 0x1f2   : > { %824 = vst [vmem:[#allocation2 + $0x60] sm:$0xff] %v808_v54 }
 0x1f5   : > { %v722_v55 = vpop.f32.mrf.mxu2  ;;  %v787_v57 = vpop.f32.mrf.mxu3 }
 0x1f6   : > { %v788_v58 = vadd.f32 %v787_v57, %v722_v55 }
 0x1f8   : > { %v809_v59 = vadd.f32 %v788_v58, %v631_v56 }
 0x1fa   : > { %825 = vst [vmem:[#allocation2 + $0x70] sm:$0xff] %v809_v59 }
 0x1fd   : > { %v725_v60 = vpop.f32.mrf.mxu2  ;;  %v790_v62 = vpop.f32.mrf.mxu3 }
 0x1fe   : > { %v791_v63 = vadd.f32 %v790_v62, %v725_v60 }
 0x200   : > { %v810_v0 = vadd.f32 %v791_v63, %v632_v61 }
 0x202   : > { %826 = vst [vmem:[#allocation2 + $0x78] sm:$0xff] %v810_v0 }
 0x205   : > { %v728_v18 = vpop.f32.mrf.mxu2  ;;  %v793_v19 = vpop.f32.mrf.mxu3 }
 0x206   : > { %v794_v2 = vadd.f32 %v793_v19, %v728_v18  ;;  %831 = sbr.rel (%p1072_p8) target bundleno = 542 (0x21e), region = 64 }
 0x208   : > { %v811_v3 = vadd.f32 %v794_v2, %v633_v1 }
 0x20a   : > { %827 = vst [vmem:[#allocation2 + $0x28] sm:$0xff] %v811_v3 }
 0x20b   : > { %v832_v4 = vld [vmem:[#allocation2 + $0x30] sm:$0xff]  ;;  %v1207_v5 = vld [vmem:[%s1952_s20] ss:$0 sm:$0xff]  ;;  %v834_v7 = vld [vmem:[#allocation2 + $0x58] sm:$0xff] }
 0x20c   : > { %v833_v6 = vld [vmem:[#allocation2] sm:$0xff]  ;;  %v835_v8 = vld [vmem:[#allocation2 + $0x18] sm:$0xff]  ;;  %v852_v9 = vadd.f32 %v1207_v5, %v832_v4  ;;  %v854_v11 = vadd.f32 %v1207_v5, %v834_v7  ;;  %v836_v12 = vld [vmem:[#allocation2 + $0x50] sm:$0xff] }
 0x20d   : > { %v853_v10 = vadd.f32 %v1207_v5, %v833_v6  ;;  %v837_v13 = vld [vmem:[#allocation2 + $0x68] sm:$0xff]  ;;  %v855_v14 = vadd.f32 %v1207_v5, %v835_v8  ;;  %v856_v16 = vadd.f32 %v1207_v5, %v836_v12  ;;  %v840_v21 = vld [vmem:[#allocation2 + $0x40] sm:$0xff]  ;;  %v842_v25 = vld [vmem:[#allocation2 + $0x10] sm:$0xff] }
 0x20e   : > { %v838_v15 = vld [vmem:[#allocation2 + $0x8] sm:$0xff]  ;;  %868 = vst [vmem:[%s1712_s30] sm:$0xff] %v852_v9  ;;  %v857_v20 = vadd.f32 %v1207_v5, %v837_v13  ;;  %v841_v23 = vld [vmem:[#allocation2 + $0x20] sm:$0xff]  ;;  %v860_v26 = vadd.f32 %v1207_v5, %v840_v21  ;;  %v843_v27 = vld [vmem:[#allocation2 + $0x38] sm:$0xff]  ;;  %v862_v30 = vadd.f32 %v1207_v5, %v842_v25 }
 0x20f   : > { %v839_v17 = vld [vmem:[#allocation2 + $0x48] sm:$0xff]  ;;  %869 = vst [vmem:[%s1712_s30 + $0x8] sm:$0xff] %v853_v10  ;;  %v858_v22 = vadd.f32 %v1207_v5, %v838_v15  ;;  %v861_v28 = vadd.f32 %v1207_v5, %v841_v23  ;;  %v844_v29 = vld [vmem:[#allocation2 + $0x60] sm:$0xff]  ;;  %v845_v31 = vld [vmem:[#allocation2 + $0x70] sm:$0xff]  ;;  %v863_v32 = vadd.f32 %v1207_v5, %v843_v27 }
 0x210   : > { %870 = vst [vmem:[%s1712_s30 + $0x10] sm:$0xff] %v854_v11  ;;  %v859_v24 = vadd.f32 %v1207_v5, %v839_v17  ;;  %v846_v33 = vld [vmem:[#allocation2 + $0x78] sm:$0xff]  ;;  %v864_v34 = vadd.f32 %v1207_v5, %v844_v29  ;;  %v865_v36 = vadd.f32 %v1207_v5, %v845_v31 }
 0x211   : > { %871 = vst [vmem:[%s1712_s30 + $0x18] sm:$0xff] %v855_v14  ;;  %v847_v35 = vld [vmem:[#allocation2 + $0x28] sm:$0xff]  ;;  %v866_v37 = vadd.f32 %v1207_v5, %v846_v33 }
 0x212   : > { %872 = vst [vmem:[%s1712_s30 + $0x20] sm:$0xff] %v856_v16  ;;  %v867_v38 = vadd.f32 %v1207_v5, %v847_v35 }
 0x213   : > { %873 = vst [vmem:[%s1712_s30 + $0x28] sm:$0xff] %v857_v20 }
 0x214   : > { %874 = vst [vmem:[%s1712_s30 + $0x30] sm:$0xff] %v858_v22 }
 0x215   : > { %875 = vst [vmem:[%s1712_s30 + $0x38] sm:$0xff] %v859_v24 }
 0x216   : > { %876 = vst [vmem:[%s1712_s30 + $0x40] sm:$0xff] %v860_v26 }
 0x217   : > { %877 = vst [vmem:[%s1712_s30 + $0x48] sm:$0xff] %v861_v28 }
 0x218   : > { %878 = vst [vmem:[%s1712_s30 + $0x50] sm:$0xff] %v862_v30 }
 0x219   : > { %879 = vst [vmem:[%s1712_s30 + $0x58] sm:$0xff] %v863_v32 }
 0x21a   : > { %880 = vst [vmem:[%s1712_s30 + $0x60] sm:$0xff] %v864_v34 }
 0x21b   : > { %881 = vst [vmem:[%s1712_s30 + $0x68] sm:$0xff] %v865_v36 }
 0x21c   : > { %882 = vst [vmem:[%s1712_s30 + $0x70] sm:$0xff] %v866_v37 }
 0x21d   : > { %883 = vst [vmem:[%s1712_s30 + $0x78] sm:$0xff] %v867_v38 }
 0x21e PF: > { %s1953_s24 = sld [smem:[#allocation19_spill]]  ;;  %s897_s12 = sshll.u32 %s1712_s30, 4  ;;  %s898_s12 = int_to_ptr.vmem [resolvable:$true] %s897_s12 }
 0x21f   : > { %s1955_s17 = sld [smem:[#allocation31_spill]]  ;;  %s885_s23 = scalar_lea.sflag [#allocation5], %s1686_s0 }
 0x224   : > { %s1081_s11 = sshll.u32 %s1953_s24, 7 }
 0x225   : > { %s896_s18 = scalar_lea.hbm %s1955_s17, %s1081_s11  ;;  %s1348_s25 = scalar_lea.hbm %s1955_s17, 256 }
 0x226   : > { %s899_s7 = sshll.u32 %s896_s18, 4  ;;  %s900_s7 = int_to_ptr.hbm [resolvable:$true] %s899_s7 }
 0x227   : > { %s1342_s28 = sshra.s32 %s900_s7, 4  ;;  %s1343_s28 = int_to_ptr.hbm [resolvable:$true] %s1342_s28 }
 0x228   : > { %s1344_s16 = scalar_lea.hbm %s1343_s28, 128  ;;  %p1349_p4 = scmp.lt.s32.totalorder %s1343_s28, %s1955_s17 }
 0x229   : > { %p1345_p11 = scmp.ne.s32.totalorder %s1343_s28, %s1344_s16  ;;  %p1350_p6 = scmp.lt.s32.totalorder %s1348_s25, %s1344_s16 }
 0x22b   : > { %p1346_p12 = pnand %p1345_p11, %p1647_p1  ;;  %p1351_p0 = por %p1350_p6, %p1349_p4 }
 0x22d   : > { %p1347_p13 = pneg %p1346_p12 }
 0x22f   : > { %p1352_p7 = pnand %p1351_p0, %p1347_p13 }
 0x231   : > { %1355 = shalt.err (!%p1352_p7)
}
 0x232   : > { %s1466_s0 = smov 128   ;;  %s1467_s15 = smov 8  }
 0x233   : > { %1090 = dma.vmem_to_hbm [thread:$0]  (%p1647_p1), %s898_s12, 2048, %s900_s7, %s885_s23, %s1466_s0, %s1466_s0, %s1467_s15  }
 0x234 PF: > { %s1956_s10 = sld [smem:[#allocation21_spill]] }
 0x235   : > { %s1957_s8 = sld [smem:[#allocation17_spill]] }
 0x23a   : > { %p1110_p9 = scmp.ge.s32.totalorder %s1956_s10, 2 }
 0x23b   : > { %s914_s30 = sand.u32 1, %s1957_s8  }
 0x23c   : > { %p1106_p10 = pnand %p1110_p9, %p1654_p2  ;;  %s915_s5 = scalar_lea.sflag [#allocation5], %s914_s30 }
 0x23e   : > { %p1107_p3 = pneg %p1106_p10 }
 0x240   : > { %1413 = dma.done.wait (%p1107_p3), %s915_s5, 2048  }
 0x241   : > { %1415 = vsyncadd (%p1107_p3), %s915_s5, 4294965248  ;;  %s27_s28 = sadd.s32 1, %s1956_s10   ;;  %s1959_s29 = sld [smem:[#allocation16_spill]] }
 0x242   : > { %p24_p5 = scmp.ge.s32.totalorder %s27_s28, 6   ;;  %s1960_s20 = sld [smem:[#allocation24_spill]] }
 0x243   : > { %s1961_s24 = sld [smem:[#allocation18_spill]]  ;;  %s1966_s18 = smov %s1422_s19 }
 0x244   : > { %s1962_s23 = sld [smem:[#allocation25_spill]]  ;;  %s1968_s21 = smov %s1434_s22 }
 0x245   : > { %s1963_s25 = sld [smem:[#allocation20_spill]] }
 0x246   : > { %s1964_s1 = sld [smem:[#allocation22_spill]] }
 0x247   : > { %s1965_s27 = sld [smem:[#allocation23_spill]]  ;;  %s1967_s19 = smov %s1959_s29 }
 0x248   :  { %26 = sbr.rel (!%p24_p5) target bundleno = 18 (0x12), region = 130 }
 0x249   : > { %s1969_s22 = smov %s1961_s24  ;;  %s1970_s24 = smov %s1450_s26 }
 0x24c   : > { %s1971_s26 = smov %s1964_s1 }
 0x24d   :  { %921 = vsyncpa [#allocation4], 1 }
 0x24e   :  { %923 = vsyncpa [#allocation4 + $0x1], 1 }
 0x24f   :  { %924 = vsyncpa [#allocation7], 1 }
 0x250   :  { %926 = vsyncpa [#allocation7 + $0x1], 1 }
 0x251   :  { %927 = vsyncpa [#allocation10], 1 }
 0x252   :  { %929 = vsyncpa [#allocation10 + $0x1], 1 }
 0x253   :  { %930 = vsyncpa [#allocation5], 1 }
 0x254   :  { %932 = vsyncpa [#allocation5 + $0x1], 1 }

</bundles_post_ra>
